<compile_context>
chip_gen: v5e
topology: v5e:2x2
jax: 0.10.0
libtpu: 0.0.40
codegen_flags: <defaults>
</compile_context>

<pallas_src>
import functools

import jax
import jax.numpy as jnp
from jax.experimental import pallas as pl
from jax.experimental.pallas import tpu as pltpu

_LANE = 128
_SUBLANE = 8


def _round_up(x, m):
    return (x + m - 1) // m * m


def mlp_kernel(x_ref, w1_ref, b1_ref, w2_ref, b2_ref, w3_ref, b3_ref,
               w4_ref, b4_ref, o_ref):
    """Fused 4-layer MLP on one batch tile: bf16 MXU matmuls, f32 epilogues."""

    def leaky_relu(h):
        # LeakyReLU(0.2) == max(h, 0.2*h) for real h (mul+max, 2 VALU ops).
        return jnp.maximum(h, 0.2 * h)

    # x arrives at natural width/dtype; cast to bf16 on-chip (no HBM
    # round-trip through a padded copy).
    x = x_ref[...].astype(jnp.bfloat16)

    h = jnp.dot(x, w1_ref[...], preferred_element_type=jnp.float32) + b1_ref[...]
    h = leaky_relu(h).astype(jnp.bfloat16)
    h = jnp.dot(h, w2_ref[...], preferred_element_type=jnp.float32) + b2_ref[...]
    h = leaky_relu(h).astype(jnp.bfloat16)
    h = jnp.dot(h, w3_ref[...], preferred_element_type=jnp.float32) + b3_ref[...]
    h = leaky_relu(h).astype(jnp.bfloat16)
    h = jnp.dot(h, w4_ref[...], preferred_element_type=jnp.float32) + b4_ref[...]

    o_ref[...] = h.astype(o_ref.dtype)


def prepare_params(params):
    """One-time (outside the jitted hot path) pad + cast of the weights.

    Hidden dim is zero-padded to a multiple of 128 (lane-dense hidden
    matmuls); nin / nout stay natural (full-dim blocks) so x reads and output
    writes do not inflate HBM bytes.  Weights -> bf16 for the MXU; biases stay
    f32 (added on the f32 accumulator).
    """
    nin = params["w1"].shape[0]
    nh = params["w1"].shape[1]
    nout = params["w4"].shape[1]
    nh_p = _round_up(nh, _LANE)

    def pad2(a, rows, cols, dtype):
        out = jnp.zeros((rows, cols), dtype)
        return out.at[:a.shape[0], :a.shape[1]].set(a.astype(dtype))

    return dict(
        w1=pad2(params["w1"], nin, nh_p, jnp.bfloat16),
        w2=pad2(params["w2"], nh_p, nh_p, jnp.bfloat16),
        w3=pad2(params["w3"], nh_p, nh_p, jnp.bfloat16),
        w4=pad2(params["w4"], nh_p, nout, jnp.bfloat16),
        b1=pad2(params["b1"], 1, nh_p, jnp.float32),
        b2=pad2(params["b2"], 1, nh_p, jnp.float32),
        b3=pad2(params["b3"], 1, nh_p, jnp.float32),
        b4=pad2(params["b4"], 1, nout, jnp.float32),
    )


def mlp_pallas(x, prepared, *, block_b=None):
    """x: (B, nin) float32. prepared: output of prepare_params()."""
    B, nin = x.shape
    nh_p = prepared["w1"].shape[1]
    nout = prepared["w4"].shape[1]

    # Batch tile: sublane-aligned, up to 1024 rows.  Grid is exactly the
    # number of real tiles (no forced >=2 steps: a zero-row tile is wasted
    # serial work on single-TC v5e/v6e).
    if block_b is None:
        block_b = min(1024, _round_up(B, _SUBLANE))
    block_b = max(_SUBLANE, _round_up(block_b, _SUBLANE))
    B_p = _round_up(B, block_b)
    grid = (B_p // block_b,)

    # Pad only the batch dim, and only when needed.
    x_in = x if B_p == B else jnp.pad(x, ((0, B_p - B), (0, 0)))

    w1, w2, w3, w4 = prepared["w1"], prepared["w2"], prepared["w3"], prepared["w4"]
    b1, b2, b3, b4 = prepared["b1"], prepared["b2"], prepared["b3"], prepared["b4"]

    def rep_spec(a):
        # Replicated across the batch grid (constant block index); a second
        # buffer for a never-changing block is pure VMEM waste.
        return pl.BlockSpec(a.shape, lambda i: (0, 0),
                            pipeline_mode=pl.Buffered(1))

    in_specs = [
        pl.BlockSpec((block_b, nin), lambda i: (i, 0)),   # x: tiled over batch
        rep_spec(w1), rep_spec(b1),
        rep_spec(w2), rep_spec(b2),
        rep_spec(w3), rep_spec(b3),
        rep_spec(w4), rep_spec(b4),
    ]
    out_specs = pl.BlockSpec((block_b, nout), lambda i: (i, 0))

    # Explicit VMEM budget: single-buffered weights/biases + double-buffered
    # x/out tiles + f32 intermediates, with 2x headroom.
    weight_bytes = sum(a.size * a.dtype.itemsize
                       for a in (w1, w2, w3, w4, b1, b2, b3, b4))
    tile_bytes = 2 * block_b * (nin + nout) * 4          # double-buffered x/out
    interm_bytes = 2 * block_b * nh_p * 4                # f32 hidden activations
    vmem_limit = int(min(128 << 20,
                         max(32 << 20,
                             2 * (weight_bytes + tile_bytes + interm_bytes))))

    flops = 2 * B_p * (nin * nh_p + 2 * nh_p * nh_p + nh_p * nout)
    bytes_accessed = (x_in.size * x_in.dtype.itemsize
                      + weight_bytes
                      + B_p * nout * 4)

    out_padded = pl.pallas_call(
        mlp_kernel,
        out_shape=jax.ShapeDtypeStruct((B_p, nout), jnp.float32),
        grid=grid,
        in_specs=in_specs,
        out_specs=out_specs,
        compiler_params=pltpu.CompilerParams(
            dimension_semantics=("parallel",),
            vmem_limit_bytes=vmem_limit),
        cost_estimate=pl.CostEstimate(
            flops=flops, transcendentals=0, bytes_accessed=bytes_accessed),
    )(x_in, w1, b1, w2, b2, w3, b3, w4, b4)

    return out_padded if B_p == B else out_padded[:B]


def init_params(key, nin, nout, nh):
    """Deterministic init mimicking nn.Linear default (uniform +-1/sqrt(fan_in))."""
    def linear(key, fan_in, fan_out):
        kw, kb = jax.random.split(key)
        bound = 1.0 / jnp.sqrt(fan_in)
        # stored as (in, out) so the kernel computes x @ W + b
        w = jax.random.uniform(kw, (fan_in, fan_out), jnp.float32, -bound, bound)
        b = jax.random.uniform(kb, (1, fan_out), jnp.float32, -bound, bound)
        return w, b

    k1, k2, k3, k4 = jax.random.split(key, 4)
    w1, b1 = linear(k1, nin, nh)
    w2, b2 = linear(k2, nh, nh)
    w3, b3 = linear(k3, nh, nh)
    w4, b4 = linear(k4, nh, nout)
    return dict(w1=w1, b1=b1, w2=w2, b2=b2, w3=w3, b3=b3, w4=w4, b4=b4)


def mlp_reference(x, p):
    def leaky(h):
        return jnp.where(h > 0, h, 0.2 * h)
    h = leaky(x @ p["w1"] + p["b1"])
    h = leaky(h @ p["w2"] + p["b2"])
    h = leaky(h @ p["w3"] + p["b3"])
    return h @ p["w4"] + p["b4"]


if __name__ == "__main__":
    nin, nout, nh = 4, 4, 32
    B = 8

    key = jax.random.PRNGKey(0)
    kx, kp = jax.random.split(key)
    x = jax.random.normal(kx, (B, nin), jnp.float32)
    params = init_params(kp, nin, nout, nh)

    prepared = prepare_params(params)        # pad/cast weights once, off the hot path
    run = jax.jit(functools.partial(mlp_pallas, block_b=None))
    out = jax.block_until_ready(run(x, prepared))

    ref = mlp_reference(x, params)
    assert out.shape == (B, nout)
    # bf16 MXU operands with f32 accumulation -> small drift vs. the f32 reference.
    assert jnp.allclose(out, ref, atol=3e-2, rtol=3e-2), (
        float(jnp.max(jnp.abs(out - ref))))

    print("KERNEL_OK")
</pallas_src>

<mosaic_0001>
module attributes {stable_mosaic.version = 11 : i64} {
  func.func @mlp_kernel(%arg0: i32, %arg1: memref<8x4xf32, #tpu.memory_space<vmem>>, %arg2: memref<4x128xbf16, #tpu.memory_space<vmem>>, %arg3: memref<1x128xf32, #tpu.memory_space<vmem>>, %arg4: memref<128x128xbf16, #tpu.memory_space<vmem>>, %arg5: memref<1x128xf32, #tpu.memory_space<vmem>>, %arg6: memref<128x128xbf16, #tpu.memory_space<vmem>>, %arg7: memref<1x128xf32, #tpu.memory_space<vmem>>, %arg8: memref<128x4xbf16, #tpu.memory_space<vmem>>, %arg9: memref<1x4xf32, #tpu.memory_space<vmem>>, %arg10: memref<8x4xf32, #tpu.memory_space<vmem>>) attributes {dimension_semantics = [#tpu.dimension_semantics<parallel>], iteration_bounds = array<i64: 1>, scalar_prefetch = 0 : i64, scratch_operands = 0 : i64, tpu.core_type = #tpu.core_type<tc>, window_params = [{transform_indices = @transform_0, window_bounds = array<i64: 8, 4>}, {pipeline_mode = #tpu.pipeline_mode<synchronous>, transform_indices = @transform_1, window_bounds = array<i64: 4, 128>}, {pipeline_mode = #tpu.pipeline_mode<synchronous>, transform_indices = @transform_2, window_bounds = array<i64: 1, 128>}, {pipeline_mode = #tpu.pipeline_mode<synchronous>, transform_indices = @transform_3, window_bounds = array<i64: 128, 128>}, {pipeline_mode = #tpu.pipeline_mode<synchronous>, transform_indices = @transform_4, window_bounds = array<i64: 1, 128>}, {pipeline_mode = #tpu.pipeline_mode<synchronous>, transform_indices = @transform_5, window_bounds = array<i64: 128, 128>}, {pipeline_mode = #tpu.pipeline_mode<synchronous>, transform_indices = @transform_6, window_bounds = array<i64: 1, 128>}, {pipeline_mode = #tpu.pipeline_mode<synchronous>, transform_indices = @transform_7, window_bounds = array<i64: 128, 4>}, {pipeline_mode = #tpu.pipeline_mode<synchronous>, transform_indices = @transform_8, window_bounds = array<i64: 1, 4>}, {transform_indices = @transform_9, window_bounds = array<i64: 8, 4>}]} {
    %c0 = arith.constant 0 : index
    %c0_0 = arith.constant 0 : index
    %0 = vector.load %arg1[%c0, %c0_0] : memref<8x4xf32, #tpu.memory_space<vmem>>, vector<8x4xf32>
    %1 = arith.truncf %0 : vector<8x4xf32> to vector<8x4xbf16>
    %c0_1 = arith.constant 0 : index
    %c0_2 = arith.constant 0 : index
    %2 = vector.load %arg2[%c0_1, %c0_2] : memref<4x128xbf16, #tpu.memory_space<vmem>>, vector<4x128xbf16>
    %cst = arith.constant dense<0.000000e+00> : vector<8x128xf32>
    %3 = tpu.matmul %1, %2, %cst {dimension_numbers = #tpu.dot_dimension_numbers<[1], [0], [0], [1], [0, 0, 1, 1], [], []>} : vector<8x4xbf16>, vector<4x128xbf16>, vector<8x128xf32> -> vector<8x128xf32>
    %c0_3 = arith.constant 0 : index
    %c0_4 = arith.constant 0 : index
    %4 = vector.load %arg3[%c0_3, %c0_4] : memref<1x128xf32, #tpu.memory_space<vmem>>, vector<1x128xf32>
    %5 = vector.broadcast %4 : vector<1x128xf32> to vector<8x128xf32>
    %6 = arith.addf %3, %5 : vector<8x128xf32>
    %cst_5 = arith.constant 2.000000e-01 : f32
    %7 = vector.broadcast %cst_5 : f32 to vector<8x128xf32>
    %8 = arith.mulf %7, %6 : vector<8x128xf32>
    %9 = arith.maximumf %6, %8 : vector<8x128xf32>
    %10 = arith.truncf %9 : vector<8x128xf32> to vector<8x128xbf16>
    %c0_6 = arith.constant 0 : index
    %c0_7 = arith.constant 0 : index
    %11 = vector.load %arg4[%c0_6, %c0_7] : memref<128x128xbf16, #tpu.memory_space<vmem>>, vector<128x128xbf16>
    %cst_8 = arith.constant dense<0.000000e+00> : vector<8x128xf32>
    %12 = tpu.matmul %10, %11, %cst_8 {dimension_numbers = #tpu.dot_dimension_numbers<[1], [0], [0], [1], [0, 0, 1, 1], [], []>} : vector<8x128xbf16>, vector<128x128xbf16>, vector<8x128xf32> -> vector<8x128xf32>
    %c0_9 = arith.constant 0 : index
    %c0_10 = arith.constant 0 : index
    %13 = vector.load %arg5[%c0_9, %c0_10] : memref<1x128xf32, #tpu.memory_space<vmem>>, vector<1x128xf32>
    %14 = vector.broadcast %13 : vector<1x128xf32> to vector<8x128xf32>
    %15 = arith.addf %12, %14 : vector<8x128xf32>
    %cst_11 = arith.constant 2.000000e-01 : f32
    %16 = vector.broadcast %cst_11 : f32 to vector<8x128xf32>
    %17 = arith.mulf %16, %15 : vector<8x128xf32>
    %18 = arith.maximumf %15, %17 : vector<8x128xf32>
    %19 = arith.truncf %18 : vector<8x128xf32> to vector<8x128xbf16>
    %c0_12 = arith.constant 0 : index
    %c0_13 = arith.constant 0 : index
    %20 = vector.load %arg6[%c0_12, %c0_13] : memref<128x128xbf16, #tpu.memory_space<vmem>>, vector<128x128xbf16>
    %cst_14 = arith.constant dense<0.000000e+00> : vector<8x128xf32>
    %21 = tpu.matmul %19, %20, %cst_14 {dimension_numbers = #tpu.dot_dimension_numbers<[1], [0], [0], [1], [0, 0, 1, 1], [], []>} : vector<8x128xbf16>, vector<128x128xbf16>, vector<8x128xf32> -> vector<8x128xf32>
    %c0_15 = arith.constant 0 : index
    %c0_16 = arith.constant 0 : index
    %22 = vector.load %arg7[%c0_15, %c0_16] : memref<1x128xf32, #tpu.memory_space<vmem>>, vector<1x128xf32>
    %23 = vector.broadcast %22 : vector<1x128xf32> to vector<8x128xf32>
    %24 = arith.addf %21, %23 : vector<8x128xf32>
    %cst_17 = arith.constant 2.000000e-01 : f32
    %25 = vector.broadcast %cst_17 : f32 to vector<8x128xf32>
    %26 = arith.mulf %25, %24 : vector<8x128xf32>
    %27 = arith.maximumf %24, %26 : vector<8x128xf32>
    %28 = arith.truncf %27 : vector<8x128xf32> to vector<8x128xbf16>
    %c0_18 = arith.constant 0 : index
    %c0_19 = arith.constant 0 : index
    %29 = vector.load %arg8[%c0_18, %c0_19] : memref<128x4xbf16, #tpu.memory_space<vmem>>, vector<128x4xbf16>
    %cst_20 = arith.constant dense<0.000000e+00> : vector<8x4xf32>
    %30 = tpu.matmul %28, %29, %cst_20 {dimension_numbers = #tpu.dot_dimension_numbers<[1], [0], [0], [1], [0, 0, 1, 1], [], []>} : vector<8x128xbf16>, vector<128x4xbf16>, vector<8x4xf32> -> vector<8x4xf32>
    %c0_21 = arith.constant 0 : index
    %c0_22 = arith.constant 0 : index
    %31 = vector.load %arg9[%c0_21, %c0_22] : memref<1x4xf32, #tpu.memory_space<vmem>>, vector<1x4xf32>
    %32 = vector.broadcast %31 : vector<1x4xf32> to vector<8x4xf32>
    %33 = arith.addf %30, %32 : vector<8x4xf32>
    %c0_23 = arith.constant 0 : index
    %c0_24 = arith.constant 0 : index
    %34 = vector.load %arg10[%c0_23, %c0_24] : memref<8x4xf32, #tpu.memory_space<vmem>>, vector<8x4xf32>
    tpu.vector_store %arg10[%c0_23, %c0_24], %33 {strides = array<i32>} : memref<8x4xf32, #tpu.memory_space<vmem>>, vector<8x4xf32>,
    return
  }
  func.func @transform_0(%arg0: i32) -> (i32, i32) {
    %c0_i32 = arith.constant 0 : i32
    %c0_i32_0 = arith.constant 0 : i32
    return %arg0, %c0_i32 : i32, i32
  }
  func.func @transform_1(%arg0: i32) -> (i32, i32) {
    %c0_i32 = arith.constant 0 : i32
    %c0_i32_0 = arith.constant 0 : i32
    %c0_i32_1 = arith.constant 0 : i32
    return %c0_i32, %c0_i32_0 : i32, i32
  }
  func.func @transform_2(%arg0: i32) -> (i32, i32) {
    %c0_i32 = arith.constant 0 : i32
    %c0_i32_0 = arith.constant 0 : i32
    %c0_i32_1 = arith.constant 0 : i32
    return %c0_i32, %c0_i32_0 : i32, i32
  }
  func.func @transform_3(%arg0: i32) -> (i32, i32) {
    %c0_i32 = arith.constant 0 : i32
    %c0_i32_0 = arith.constant 0 : i32
    %c0_i32_1 = arith.constant 0 : i32
    return %c0_i32, %c0_i32_0 : i32, i32
  }
  func.func @transform_4(%arg0: i32) -> (i32, i32) {
    %c0_i32 = arith.constant 0 : i32
    %c0_i32_0 = arith.constant 0 : i32
    %c0_i32_1 = arith.constant 0 : i32
    return %c0_i32, %c0_i32_0 : i32, i32
  }
  func.func @transform_5(%arg0: i32) -> (i32, i32) {
    %c0_i32 = arith.constant 0 : i32
    %c0_i32_0 = arith.constant 0 : i32
    %c0_i32_1 = arith.constant 0 : i32
    return %c0_i32, %c0_i32_0 : i32, i32
  }
  func.func @transform_6(%arg0: i32) -> (i32, i32) {
    %c0_i32 = arith.constant 0 : i32
    %c0_i32_0 = arith.constant 0 : i32
    %c0_i32_1 = arith.constant 0 : i32
    return %c0_i32, %c0_i32_0 : i32, i32
  }
  func.func @transform_7(%arg0: i32) -> (i32, i32) {
    %c0_i32 = arith.constant 0 : i32
    %c0_i32_0 = arith.constant 0 : i32
    %c0_i32_1 = arith.constant 0 : i32
    return %c0_i32, %c0_i32_0 : i32, i32
  }
  func.func @transform_8(%arg0: i32) -> (i32, i32) {
    %c0_i32 = arith.constant 0 : i32
    %c0_i32_0 = arith.constant 0 : i32
    %c0_i32_1 = arith.constant 0 : i32
    return %c0_i32, %c0_i32_0 : i32, i32
  }
  func.func @transform_9(%arg0: i32) -> (i32, i32) {
    %c0_i32 = arith.constant 0 : i32
    %c0_i32_0 = arith.constant 0 : i32
    return %arg0, %c0_i32 : i32, i32
  }
}

</mosaic_0001>

<bundles_post_ra>
// kernel: mlp_pallas.1
= control target key start
LH: loop header
LB: loop body
LE: loop exit
PB: predicated region body
PF: predicated region fallthrough
CT: control target
= control target key end

     0   :  { %14 = vsyncpa [#allocation3], 0  ;;  %s489_s12 = smov [#allocation2]   ;;  %s490_s14 = smov 64   ;;  %s616_s0 = inlined_call_operand.vmem [shape: f32[8,4], index: 0, kind: input, shape index: {}]   ;;  %s617_s1 = inlined_call_operand.vmem [shape: bf16[4,128], index: 1, kind: input, shape index: {}]   ;;  %s618_s2 = inlined_call_operand.vmem [shape: f32[1,128], index: 2, kind: input, shape index: {}]   ;;  %s619_s3 = inlined_call_operand.vmem [shape: bf16[128,128], index: 3, kind: input, shape index: {}]   ;;  %s620_s4 = inlined_call_operand.vmem [shape: f32[1,128], index: 4, kind: input, shape index: {}]   ;;  %s621_s5 = inlined_call_operand.hbm [shape: bf16[128,128], index: 5, kind: input, shape index: {}]   ;;  %s622_s6 = inlined_call_operand.vmem [shape: f32[1,128], index: 6, kind: input, shape index: {}]   ;;  %s623_s7 = inlined_call_operand.vmem [shape: bf16[128,4], index: 7, kind: input, shape index: {}]   ;;  %s624_s8 = inlined_call_operand.vmem [shape: f32[1,4], index: 8, kind: input, shape index: {}]   ;;  %s625_s9 = inlined_call_operand.vmem [shape: f32[8,4], index: 9, kind: output, shape index: {}]  }
   0x1   :  { %s29_s11 = sshll.u32 %s621_s5, 4  ;;  %s31_s13 = sshll.u32 %s489_s12, 4  ;;  %s30_s11 = int_to_ptr.hbm [resolvable:$true] %s29_s11  ;;  %s32_s13 = int_to_ptr.vmem [resolvable:$true] %s31_s13 }
   0x2   :  { %s491_s15 = smov 4  }
   0x3   :  { %37 = dma.hbm_to_vmem [thread:$0]  %s30_s11, 1024, %s32_s13, [#allocation3], %s490_s14, %s490_s14, %s491_s15  }
   0x4   :  { %487 = dma.done.wait [#allocation3], 1024  }
   0x5   :  { %488 = vsyncadd [#allocation3], 4294966272  ;;  %vm60_vm0 = vcmask 1041408   ;;  %v51_v0 = vld [vmem:[%s617_s1] sm:$0x3]  ;;  %v439_v2 = vld [vmem:[%s619_s3 + $0x38] sm:$0xff] }
   0x6   :  { %v49_v1 = vld [vmem:[%s616_s0] sm:$0xff]  ;;  %v62_v3 = vsel %vm60_vm0, %v51_v0, 0  ;;  %vm56_vm1 = vcmask 31744   ;;  %148 = vmatpush.bf16.msra.mxu1 %v439_v2  ;;  %v438_v5 = vld [vmem:[%s619_s3 + $0x30] sm:$0xff]  ;;  %v437_v6 = vld [vmem:[%s619_s3 + $0x28] sm:$0xff] }
   0x7   :  { %v50_v4 = vpack.c.bf16 %v49_v1, %v49_v1  ;;  %71 = vmatpush.bf16.msra.mxu0 %v62_v3  ;;  %v436_v7 = vld [vmem:[%s619_s3 + $0x20] sm:$0xff]  ;;  %v435_v8 = vld [vmem:[%s619_s3 + $0x18] sm:$0xff]  ;;  %v434_v9 = vld [vmem:[%s619_s3 + $0x10] sm:$0xff] }
   0x8   :  { %v433_v10 = vld [vmem:[%s619_s3 + $0x8] sm:$0xff]  ;;  %v432_v11 = vld [vmem:[%s619_s3] sm:$0xff]  ;;  %v447_v12 = vld [vmem:[#allocation2 + $0x38] sm:$0xff] }
   0x9   :  { %232 = vmatpush.bf16.msra.mxu2 %v447_v12  ;;  %v446_v13 = vld [vmem:[#allocation2 + $0x30] sm:$0xff]  ;;  %v445_v14 = vld [vmem:[#allocation2 + $0x28] sm:$0xff]  ;;  %v444_v15 = vld [vmem:[#allocation2 + $0x20] sm:$0xff] }
   0xa   :  { %335 = vmatmul.msk.bf16.vlgmr.msra.gmra.mxu0 %vm56_vm1, %v50_v4  ;;  %149 = vmatpush.bf16.msra.mxu1 %v438_v5  ;;  %v443_v16 = vld [vmem:[#allocation2 + $0x18] sm:$0xff]  ;;  %v442_v17 = vld [vmem:[#allocation2 + $0x10] sm:$0xff]  ;;  %v459_v18 = vld [vmem:[%s618_s2] ss:$0 sm:$0xff] }
   0xb   :  { %v441_v25 = vld [vmem:[#allocation2 + $0x8] sm:$0xff]  ;;  %v440_v26 = vld [vmem:[#allocation2] sm:$0xff]  ;;  %v455_v27 = vld [vmem:[%s623_s7 + $0x38] sm:$0xff] }
   0xc   :  { %316 = vmatpush.bf16.msra.mxu3 %v455_v27  ;;  %v454_v28 = vld [vmem:[%s623_s7 + $0x30] sm:$0xff]  ;;  %v453_v29 = vld [vmem:[%s623_s7 + $0x28] sm:$0xff]  ;;  %v452_v30 = vld [vmem:[%s623_s7 + $0x20] sm:$0xff] }
   0xd   :  { %233 = vmatpush.bf16.msra.mxu2 %v446_v13  ;;  %v451_v31 = vld [vmem:[%s623_s7 + $0x18] sm:$0xff]  ;;  %v450_v32 = vld [vmem:[%s623_s7 + $0x10] sm:$0xff]  ;;  %v460_v33 = vld [vmem:[%s620_s4] ss:$0 sm:$0xff] }
   0xe   :  { %150 = vmatpush.bf16.msra.mxu1 %v437_v6  ;;  %v449_v40 = vld [vmem:[%s623_s7 + $0x8] sm:$0xff]  ;;  %v448_v41 = vld [vmem:[%s623_s7] sm:$0xff] }
   0xf   :  { %v461_v42 = vld [vmem:[%s622_s6] ss:$0 sm:$0xff] }
  0x10   :  { %317 = vmatpush.bf16.msra.mxu3 %v454_v28  ;;  %v462_v49 = vld [vmem:[%s624_s8] ss:$0 sm:$0xff] }
  0x11   :  { %234 = vmatpush.bf16.msra.mxu2 %v445_v14 }
  0x12   :  { %151 = vmatpush.bf16.msra.mxu1 %v436_v7 }
  0x14   :  { %318 = vmatpush.bf16.msra.mxu3 %v453_v29 }
  0x15   :  { %235 = vmatpush.bf16.msra.mxu2 %v444_v15 }
  0x16   :  { %152 = vmatpush.bf16.msra.mxu1 %v435_v8 }
  0x18   :  { %319 = vmatpush.bf16.msra.mxu3 %v452_v30 }
  0x19   :  { %236 = vmatpush.bf16.msra.mxu2 %v443_v16 }
  0x1a   :  { %153 = vmatpush.bf16.msra.mxu1 %v434_v9 }
  0x1c   :  { %320 = vmatpush.bf16.msra.mxu3 %v451_v31 }
  0x1d   :  { %237 = vmatpush.bf16.msra.mxu2 %v442_v17 }
  0x1e   :  { %154 = vmatpush.bf16.msra.mxu1 %v433_v10 }
  0x20   :  { %321 = vmatpush.bf16.msra.mxu3 %v450_v32 }
  0x21   :  { %238 = vmatpush.bf16.msra.mxu2 %v441_v25 }
  0x22   :  { %155 = vmatpush.bf16.msra.mxu1 %v432_v11 }
  0x24   :  { %322 = vmatpush.bf16.msra.mxu3 %v449_v40 }
  0x25   :  { %239 = vmatpush.bf16.msra.mxu2 %v440_v26 }
  0x28   :  { %323 = vmatpush.bf16.msra.mxu3 %v448_v41 }
  0x87   :  { %v73_v19 = vpop.f32.mrf.mxu0 }
  0x88   :  { %v74_v20 = vadd.f32 %v459_v18, %v73_v19 }
  0x8a   :  { %v77_v21 = vmul.f32 0.2, %v74_v20 }
  0x8c   :  { %v78_v22 = vmax.f32 %v74_v20, %v77_v21 }
  0x8e   :  { %v79_v23 = vpack.c.bf16 %v78_v22, %v78_v22 }
  0x8f   :  { %v75_v24 = vpop.f32.mrf.mxu0 }
  0x90   :  { %156 = vmatmul.bf16.vlgmr.msra.gmra.mxu1 %v79_v23 }
 0x10d   :  { %v157_v34 = vpop.f32.mrf.mxu1 }
 0x10e   :  { %v158_v35 = vadd.f32 %v460_v33, %v157_v34 }
 0x110   :  { %v161_v36 = vmul.f32 0.2, %v158_v35 }
 0x112   :  { %v162_v37 = vmax.f32 %v158_v35, %v161_v36 }
 0x114   :  { %v163_v38 = vpack.c.bf16 %v162_v37, %v162_v37 }
 0x115   :  { %v159_v39 = vpop.f32.mrf.mxu1 }
 0x116   :  { %240 = vmatmul.bf16.vlgmr.msra.gmra.mxu2 %v163_v38 }
 0x199   :  { %v241_v43 = vpop.f32.mrf.mxu2 }
 0x19a   :  { %v242_v44 = vadd.f32 %v461_v42, %v241_v43 }
 0x19c   :  { %v245_v45 = vmul.f32 0.2, %v242_v44 }
 0x19e   :  { %v246_v46 = vmax.f32 %v242_v44, %v245_v45 }
 0x1a0   :  { %v247_v47 = vpack.c.bf16 %v246_v46, %v246_v46 }
 0x1a1   :  { %v243_v48 = vpop.f32.mrf.mxu2 }
 0x1a2   :  { %324 = vmatmul.bf16.vlgmr.msra.gmra.mxu3 %v247_v47 }
 0x225   :  { %v325_v50 = vpop.f32.mrf.mxu3 }
 0x226   :  { %v326_v51 = vadd.f32 %v462_v49, %v325_v50 }
 0x228   :  { %329 = vst.msk [vmem:[%s625_s9] sm:$0xff] %vm56_vm1, %v326_v51 }
 0x22d   :  { %v327_v52 = vpop.f32.mrf.mxu3 }
 0x22e   :  { %334 = vsyncpa [#allocation3], 1 }

</bundles_post_ra>
